<compile_context>
chip_gen: v5e
topology: v5e:2x2
jax: 0.10.0
libtpu: 0.0.40
codegen_flags: <defaults>
</compile_context>

<pallas_src>
import numpy as np
import jax
import jax.numpy as jnp
from jax import lax
from jax.experimental import pallas as pl
from jax.experimental.pallas import tpu as pltpu

# ---- fixed problem sizes (consistent with the module's forward) ----
D = 4                 # number of dense features
S = 3                 # number of sparse features
V = 8                 # codebook rows per sparse feature (row V-1 reserved for "missing")
E = 4                 # encoding width per sparse feature
DIN = D + S * E       # 16 : input width of the inner model
H = 32                # hidden width of the inner MLP
C = 2                 # output classes
CP = 8                # sublane-padded output rows (transposed output is [CP, B])
F = D + S             # 7 raw feature columns
TB_TARGET = 2048      # max batch tile (lanes per grid step)


def _fused_kernel(xt_ref, wx_ref, we_ref, b1_ref, w2_ref, b2_ref, out_ref):
    # xt_ref : [F, TB]   f32 feature-major x tile (dense rows 0:D, sparse-id rows D:F)
    # wx_ref : [H, F]    f32 w1[:D].T, zero-padded over the sparse-id columns
    # we_ref : [H, S*V]  f32 (codebook folded into w1).T
    # b1_ref : [H, 1]    f32
    # w2_ref : [CP, H]   f32 w2.T, zero rows beyond C
    # b2_ref : [CP, 1]   f32 zero beyond C
    # out_ref: [CP, TB]  f32 transposed output -> lane-dense batch stores
    xt = xt_ref[...]                                        # [F, tb]
    tb = xt.shape[1]

    # dense contribution: Wx is zero over the id columns, so the full x tile is used
    # directly (no sublane slice / relayout needed).
    h = jnp.dot(wx_ref[...], xt, preferred_element_type=jnp.float32)      # [H, tb]

    # sparse ids -> one global one-hot [S*V, tb] (row = s*V + v), missing-value remap
    ids = xt[D:D + S, :].astype(jnp.int32)                  # [S, tb]
    ids = jnp.where(ids == -1, V - 1, ids)                  # -1 -> last codebook row
    ids = jnp.clip(ids, 0, V - 1)                           # guard malformed ids
    viota = lax.broadcasted_iota(jnp.int32, (V, tb), 0)     # [V, tb]
    onehot = jnp.concatenate(
        [(ids[s:s + 1, :] == viota).astype(jnp.float32) for s in range(S)],
        axis=0)                                             # [S*V, tb], 8-row aligned

    # fused (gather . concat . Linear) via folded embedding weight, then ReLU
    h = h + jnp.dot(we_ref[...], onehot, preferred_element_type=jnp.float32)
    h = jnp.maximum(h + b1_ref[...], 0.0)                   # [H, tb]

    # second Linear, transposed: [CP, tb] lane-dense store
    out_ref[...] = (jnp.dot(w2_ref[...], h, preferred_element_type=jnp.float32)
                    + b2_ref[...])


def _pick_tb(batch):
    # Big tiles amortize the ~0.35 us per-grid-step overhead, but keep >= 2 grid steps
    # so v7x's two TensorCores both get work.  Lane dim must be a multiple of 128.
    half = -(-batch // 2)                 # cdiv(batch, 2)
    half = -(-half // 128) * 128          # round up to 128 lanes
    return max(128, min(TB_TARGET, half))


def model_for_shap_forward(x, dense_index, sparse_index, codebook, w1, b1, w2, b2, *, tb=None):
    """Equivalent of Model_for_shap.forward(x) with an MLP inner model."""
    dense_index = np.asarray(dense_index)
    sparse_index = np.asarray(sparse_index)
    assert dense_index.size == D and sparse_index.size == S

    # If the feature indices are not the contiguous [dense | sparse] layout, reorder once
    # in the wrapper; otherwise pass x straight through.
    contiguous = (np.array_equal(dense_index, np.arange(D)) and
                  np.array_equal(sparse_index, np.arange(D, D + S)))
    if not contiguous:
        x = jnp.take(x, jnp.asarray(np.concatenate([dense_index, sparse_index])), axis=1)
    x = x.astype(jnp.float32)
    Bx = x.shape[0]

    if tb is None:
        tb = _pick_tb(Bx)
    nb = pl.cdiv(Bx, tb)
    bp = nb * tb

    # feature-major input: 7 contiguous tb*4-byte rows per tile instead of thousands of
    # 28-byte strided row DMAs.
    xt = x.T
    if bp != Bx:
        xt = jnp.pad(xt, ((0, 0), (0, bp - Bx)))

    # ---- one-time weight folding (XLA, outside the kernel) ----
    w1 = w1.astype(jnp.float32)
    wx_t = jnp.zeros((H, F), jnp.float32).at[:, :D].set(w1[:D, :].T)       # [H, F]
    w_emb = jnp.concatenate(
        [codebook[s].astype(jnp.float32) @ w1[D + s * E:D + (s + 1) * E, :]
         for s in range(S)], axis=0)                                       # [S*V, H]
    we_t = w_emb.T                                                         # [H, S*V]
    b1_t = b1.astype(jnp.float32).reshape(H, 1)
    w2_t = jnp.zeros((CP, H), jnp.float32).at[:C, :].set(w2.astype(jnp.float32).T)
    b2_t = jnp.zeros((CP, 1), jnp.float32).at[:C, 0].set(b2.astype(jnp.float32).reshape(-1))

    grid_spec = pltpu.PrefetchScalarGridSpec(
        num_scalar_prefetch=0,
        grid=(nb,),
        in_specs=[
            pl.BlockSpec((F, tb), lambda i: (0, i)),         # x tile streams over batch
            pl.BlockSpec((H, F), lambda i: (0, 0)),          # weights stay VMEM-resident
            pl.BlockSpec((H, S * V), lambda i: (0, 0)),
            pl.BlockSpec((H, 1), lambda i: (0, 0)),
            pl.BlockSpec((CP, H), lambda i: (0, 0)),
            pl.BlockSpec((CP, 1), lambda i: (0, 0)),
        ],
        out_specs=pl.BlockSpec((CP, tb), lambda i: (0, i)),  # lane-dense along batch
    )

    out_t = pl.pallas_call(
        _fused_kernel,
        out_shape=jax.ShapeDtypeStruct((CP, bp), jnp.float32),
        grid_spec=grid_spec,
        compiler_params=pltpu.CompilerParams(
            dimension_semantics=("parallel",)),              # megacore-shard the batch
    )(xt, wx_t, we_t, b1_t, w2_t, b2_t)

    return out_t[:C, :Bx].T


def reference_forward(x, dense_index, sparse_index, codebook, w1, b1, w2, b2):
    """Pure-JAX reference mirroring the PyTorch module literally (no folding)."""
    x_dense = x[:, dense_index].astype(jnp.float32)
    ids = x[:, sparse_index].astype(jnp.int32)
    ids = jnp.where(ids == -1, V - 1, ids)
    embs = [codebook[s][ids[:, s]] for s in range(S)]          # torch.gather(codebook, 0, index)
    x_ = jnp.concatenate([x_dense] + embs, axis=1)             # [B, DIN]
    h = jnp.maximum(x_ @ w1 + b1, 0.0)
    return h @ w2 + b2


if __name__ == "__main__":
    key = jax.random.PRNGKey(0)
    k_dense, k_sparse, k_cb, k_w1, k_b1, k_w2, k_b2 = jax.random.split(key, 7)

    B = 512   # many perturbation rows per call (SHAP-style); grid = (2,) with tb=256

    # x: [B, F] with F = D + S; dense cols are floats, sparse cols are category ids
    # in [-1, V-2] stored as float (as SHAP-style inputs are).
    dense_vals = jax.random.normal(k_dense, (B, D), dtype=jnp.float32)
    sparse_vals = jax.random.randint(k_sparse, (B, S), -1, V - 1).astype(jnp.float32)
    x = jnp.concatenate([dense_vals, sparse_vals], axis=1)     # [B, D + S]

    dense_index = np.arange(0, D)
    sparse_index = np.arange(D, D + S)

    # Per-feature codebooks [S, V, E]; row V-1 is the "missing value" encoding.
    codebook = jax.random.normal(k_cb, (S, V, E), dtype=jnp.float32)

    # Inner-model parameters (Linear(DIN,H) -> ReLU -> Linear(H,C)).
    w1 = jax.random.normal(k_w1, (DIN, H), dtype=jnp.float32) * 0.1
    b1 = jax.random.normal(k_b1, (1, H), dtype=jnp.float32) * 0.1
    w2 = jax.random.normal(k_w2, (H, C), dtype=jnp.float32) * 0.1
    b2 = jax.random.normal(k_b2, (1, C), dtype=jnp.float32) * 0.1

    out = model_for_shap_forward(x, dense_index, sparse_index, codebook, w1, b1, w2, b2)
    out = jax.block_until_ready(out)

    ref = reference_forward(x, dense_index, sparse_index, codebook, w1, b1, w2, b2)
    assert out.shape == (B, C)
    assert jnp.allclose(out, ref, atol=1e-4, rtol=1e-4), "mismatch vs JAX reference"

    print("KERNEL_OK")
</pallas_src>

<mosaic_0001>
module attributes {stable_mosaic.version = 11 : i64} {
  func.func @_fused_kernel(%arg0: i32, %arg1: memref<7x256xf32, #tpu.memory_space<vmem>>, %arg2: memref<32x7xf32, #tpu.memory_space<vmem>>, %arg3: memref<32x24xf32, #tpu.memory_space<vmem>>, %arg4: memref<32x1xf32, #tpu.memory_space<vmem>>, %arg5: memref<8x32xf32, #tpu.memory_space<vmem>>, %arg6: memref<8x1xf32, #tpu.memory_space<vmem>>, %arg7: memref<8x256xf32, #tpu.memory_space<vmem>>) attributes {dimension_semantics = [#tpu.dimension_semantics<parallel>], iteration_bounds = array<i64: 2>, scalar_prefetch = 0 : i64, scratch_operands = 0 : i64, tpu.core_type = #tpu.core_type<tc>, window_params = [{transform_indices = @transform_0, window_bounds = array<i64: 7, 256>}, {pipeline_mode = #tpu.pipeline_mode<synchronous>, transform_indices = @transform_1, window_bounds = array<i64: 32, 7>}, {pipeline_mode = #tpu.pipeline_mode<synchronous>, transform_indices = @transform_2, window_bounds = array<i64: 32, 24>}, {pipeline_mode = #tpu.pipeline_mode<synchronous>, transform_indices = @transform_3, window_bounds = array<i64: 32, 1>}, {pipeline_mode = #tpu.pipeline_mode<synchronous>, transform_indices = @transform_4, window_bounds = array<i64: 8, 32>}, {pipeline_mode = #tpu.pipeline_mode<synchronous>, transform_indices = @transform_5, window_bounds = array<i64: 8, 1>}, {transform_indices = @transform_6, window_bounds = array<i64: 8, 256>}]} {
    %c0 = arith.constant 0 : index
    %c0_0 = arith.constant 0 : index
    %0 = vector.load %arg1[%c0, %c0_0] : memref<7x256xf32, #tpu.memory_space<vmem>>, vector<7x256xf32>
    %c0_1 = arith.constant 0 : index
    %c0_2 = arith.constant 0 : index
    %1 = vector.load %arg2[%c0_1, %c0_2] : memref<32x7xf32, #tpu.memory_space<vmem>>, vector<32x7xf32>
    %cst = arith.constant dense<0.000000e+00> : vector<32x256xf32>
    %2 = tpu.matmul %1, %0, %cst {dimension_numbers = #tpu.dot_dimension_numbers<[1], [0], [0], [1], [0, 0, 1, 1], [], []>} : vector<32x7xf32>, vector<7x256xf32>, vector<32x256xf32> -> vector<32x256xf32>
    %3 = vector.extract_strided_slice %0 {offsets = [4, 0], sizes = [3, 256], strides = [1, 1]} : vector<7x256xf32> to vector<3x256xf32>
    %4 = arith.fptosi %3 : vector<3x256xf32> to vector<3x256xi32>
    %c-1_i32 = arith.constant -1 : i32
    %5 = vector.broadcast %c-1_i32 : i32 to vector<3x256xi32>
    %6 = arith.cmpi eq, %4, %5 : vector<3x256xi32>
    %c7_i32 = arith.constant 7 : i32
    %7 = vector.broadcast %c7_i32 : i32 to vector<3x256xi32>
    %8 = arith.select %6, %7, %4 : vector<3x256xi1>, vector<3x256xi32>
    %c0_i32 = arith.constant 0 : i32
    %c7_i32_3 = arith.constant 7 : i32
    %9 = vector.broadcast %c0_i32 : i32 to vector<3x256xi32>
    %10 = arith.maxsi %9, %8 : vector<3x256xi32>
    %11 = vector.broadcast %c7_i32_3 : i32 to vector<3x256xi32>
    %12 = arith.minsi %11, %10 : vector<3x256xi32>
    %13 = tpu.iota {dimensions = array<i32: 0>} : vector<8x256xi32>
    %14 = vector.extract_strided_slice %12 {offsets = [0, 0], sizes = [1, 256], strides = [1, 1]} : vector<3x256xi32> to vector<1x256xi32>
    %15 = vector.broadcast %14 : vector<1x256xi32> to vector<8x256xi32>
    %16 = arith.cmpi eq, %15, %13 : vector<8x256xi32>
    %17 = arith.extui %16 : vector<8x256xi1> to vector<8x256xi32>
    %18 = arith.sitofp %17 : vector<8x256xi32> to vector<8x256xf32>
    %19 = vector.extract_strided_slice %12 {offsets = [1, 0], sizes = [1, 256], strides = [1, 1]} : vector<3x256xi32> to vector<1x256xi32>
    %20 = vector.broadcast %19 : vector<1x256xi32> to vector<8x256xi32>
    %21 = arith.cmpi eq, %20, %13 : vector<8x256xi32>
    %22 = arith.extui %21 : vector<8x256xi1> to vector<8x256xi32>
    %23 = arith.sitofp %22 : vector<8x256xi32> to vector<8x256xf32>
    %24 = vector.extract_strided_slice %12 {offsets = [2, 0], sizes = [1, 256], strides = [1, 1]} : vector<3x256xi32> to vector<1x256xi32>
    %25 = vector.broadcast %24 : vector<1x256xi32> to vector<8x256xi32>
    %26 = arith.cmpi eq, %25, %13 : vector<8x256xi32>
    %27 = arith.extui %26 : vector<8x256xi1> to vector<8x256xi32>
    %28 = arith.sitofp %27 : vector<8x256xi32> to vector<8x256xf32>
    %29 = tpu.concatenate %18, %23, %28 in 0 : vector<8x256xf32>, vector<8x256xf32>, vector<8x256xf32> -> vector<24x256xf32>
    %c0_4 = arith.constant 0 : index
    %c0_5 = arith.constant 0 : index
    %30 = vector.load %arg3[%c0_4, %c0_5] : memref<32x24xf32, #tpu.memory_space<vmem>>, vector<32x24xf32>
    %cst_6 = arith.constant dense<0.000000e+00> : vector<32x256xf32>
    %31 = tpu.matmul %30, %29, %cst_6 {dimension_numbers = #tpu.dot_dimension_numbers<[1], [0], [0], [1], [0, 0, 1, 1], [], []>} : vector<32x24xf32>, vector<24x256xf32>, vector<32x256xf32> -> vector<32x256xf32>
    %32 = arith.addf %2, %31 : vector<32x256xf32>
    %c0_7 = arith.constant 0 : index
    %c0_8 = arith.constant 0 : index
    %33 = vector.load %arg4[%c0_7, %c0_8] : memref<32x1xf32, #tpu.memory_space<vmem>>, vector<32x1xf32>
    %34 = vector.broadcast %33 : vector<32x1xf32> to vector<32x256xf32>
    %35 = arith.addf %32, %34 : vector<32x256xf32>
    %cst_9 = arith.constant 0.000000e+00 : f32
    %36 = vector.broadcast %cst_9 : f32 to vector<32x256xf32>
    %37 = arith.maximumf %35, %36 : vector<32x256xf32>
    %c0_10 = arith.constant 0 : index
    %c0_11 = arith.constant 0 : index
    %38 = vector.load %arg5[%c0_10, %c0_11] : memref<8x32xf32, #tpu.memory_space<vmem>>, vector<8x32xf32>
    %cst_12 = arith.constant dense<0.000000e+00> : vector<8x256xf32>
    %39 = tpu.matmul %38, %37, %cst_12 {dimension_numbers = #tpu.dot_dimension_numbers<[1], [0], [0], [1], [0, 0, 1, 1], [], []>} : vector<8x32xf32>, vector<32x256xf32>, vector<8x256xf32> -> vector<8x256xf32>
    %c0_13 = arith.constant 0 : index
    %c0_14 = arith.constant 0 : index
    %40 = vector.load %arg6[%c0_13, %c0_14] : memref<8x1xf32, #tpu.memory_space<vmem>>, vector<8x1xf32>
    %41 = vector.broadcast %40 : vector<8x1xf32> to vector<8x256xf32>
    %42 = arith.addf %39, %41 : vector<8x256xf32>
    %c0_15 = arith.constant 0 : index
    %c0_16 = arith.constant 0 : index
    %43 = vector.load %arg7[%c0_15, %c0_16] : memref<8x256xf32, #tpu.memory_space<vmem>>, vector<8x256xf32>
    tpu.vector_store %arg7[%c0_15, %c0_16], %42 {strides = array<i32>} : memref<8x256xf32, #tpu.memory_space<vmem>>, vector<8x256xf32>,
    return
  }
  func.func @transform_0(%arg0: i32) -> (i32, i32) {
    %c0_i32 = arith.constant 0 : i32
    %c0_i32_0 = arith.constant 0 : i32
    return %c0_i32, %arg0 : i32, i32
  }
  func.func @transform_1(%arg0: i32) -> (i32, i32) {
    %c0_i32 = arith.constant 0 : i32
    %c0_i32_0 = arith.constant 0 : i32
    %c0_i32_1 = arith.constant 0 : i32
    return %c0_i32, %c0_i32_0 : i32, i32
  }
  func.func @transform_2(%arg0: i32) -> (i32, i32) {
    %c0_i32 = arith.constant 0 : i32
    %c0_i32_0 = arith.constant 0 : i32
    %c0_i32_1 = arith.constant 0 : i32
    return %c0_i32, %c0_i32_0 : i32, i32
  }
  func.func @transform_3(%arg0: i32) -> (i32, i32) {
    %c0_i32 = arith.constant 0 : i32
    %c0_i32_0 = arith.constant 0 : i32
    %c0_i32_1 = arith.constant 0 : i32
    return %c0_i32, %c0_i32_0 : i32, i32
  }
  func.func @transform_4(%arg0: i32) -> (i32, i32) {
    %c0_i32 = arith.constant 0 : i32
    %c0_i32_0 = arith.constant 0 : i32
    %c0_i32_1 = arith.constant 0 : i32
    return %c0_i32, %c0_i32_0 : i32, i32
  }
  func.func @transform_5(%arg0: i32) -> (i32, i32) {
    %c0_i32 = arith.constant 0 : i32
    %c0_i32_0 = arith.constant 0 : i32
    %c0_i32_1 = arith.constant 0 : i32
    return %c0_i32, %c0_i32_0 : i32, i32
  }
  func.func @transform_6(%arg0: i32) -> (i32, i32) {
    %c0_i32 = arith.constant 0 : i32
    %c0_i32_0 = arith.constant 0 : i32
    return %c0_i32, %arg0 : i32, i32
  }
}

</mosaic_0001>

<bundles_post_ra>
// kernel: tpu_custom_call.1
= control target key start
LH: loop header
LB: loop body
LE: loop exit
PB: predicated region body
PF: predicated region fallthrough
CT: control target
= control target key end

     0   :  { %11 = vsyncpa [#allocation3], 0  ;;  %s963_s0 = inlined_call_operand.vmem [shape: f32[7,512], index: 0, kind: input, shape index: {}]   ;;  %s964_s1 = inlined_call_operand.vmem [shape: f32[32,7], index: 1, kind: input, shape index: {}]   ;;  %s965_s2 = inlined_call_operand.vmem [shape: f32[32,24], index: 2, kind: input, shape index: {}]   ;;  %s966_s3 = inlined_call_operand.vmem [shape: f32[32,1], index: 3, kind: input, shape index: {}]   ;;  %s967_s4 = inlined_call_operand.vmem [shape: f32[8,32], index: 4, kind: input, shape index: {}]   ;;  %s968_s5 = inlined_call_operand.vmem [shape: f32[8,1], index: 5, kind: input, shape index: {}]   ;;  %s969_s6 = inlined_call_operand.hbm [shape: f32[8,512], index: 6, kind: output, shape index: {}]  }
   0x1   :  { %13 = vsyncpa [#allocation3 + $0x1], 0  ;;  %s821_s21 = smov 0   ;;  %s823_s22 = smov 0  }
   0x2   :  { %s825_s23 = smov 0   ;;  %s827_s24 = smov 0  }
   0x3 LB: > { %s842_s25 = sadd.s32 4294967295, %s782_s24   ;;  %s621_s26 = sadd.s32 4294967294, %s782_s24   ;;  %s782_s24 = sphi %s827_s24, %s975_s24   ;;  %s778_s23 = sphi %s825_s23, %s974_s23   ;;  %s774_s22 = sphi %s823_s22, %s973_s22   ;;  %s770_s21 = sphi %s821_s21, %s972_s21  }
   0x4   : > { %s846_s27 = sadd.s32 1, %s782_s24   ;;  %s157_s28 = sadd.s32 1, %s778_s23 }
   0x5   : > { %s154_s29 = ssub.s32 %s782_s24, %s846_s27  ;;  %p167_p0 = scmp.ne.s32.totalorder %s778_s23, %s774_s22 }
   0x6   : > { %p155_p1 = scmp.eq.s32.totalorder %s154_s29, 0  ;;  %p168_p2 = scmp.eq.s32.totalorder %s842_s25, 1 }
   0x7   : > { %p173_p3 = scmp.ne.s32.totalorder %s774_s22, %s770_s21  ;;  %p174_p4 = scmp.eq.s32.totalorder %s621_s26, 1 }
   0x8   : > { %s857_s30 = scalar_select %p155_p1, %s778_s23, %s157_s28  }
   0x9   : > { %p859_p5 = por %p168_p2, %p167_p0  ;;  %p863_p6 = por %p174_p4, %p173_p3 }
   0xa   : > { %p624_p7 = scmp.ge.s32.totalorder %s782_s24, 1  ;;  %p216_p8 = scmp.lt.s32.totalorder %s782_s24, 3 }
   0xc   : > { %p217_p9 = pnand %p624_p7, %p216_p8 }
   0xd   : > { %s626_s9 = sshll.u32 (!%p217_p9), %s842_s25, 1  ;;  %s665_s14 = sshll.u32 (!%p217_p9), %s842_s25, 4 }
   0xe   : > { %220 = sbr.rel (%p217_p9) target bundleno = 343 (0x157), region = 44  ;;  %p247_p10 = scmp.lt.s32.totalorder (!%p217_p9), %s626_s9, 3 }
   0xf   : > { %s557_s17 = scalar_lea.hbm (!%p217_p9), %s969_s6, %s665_s14  ;;  %s740_s10 = scalar_lea.hbm (!%p217_p9), %s969_s6, 32 }
  0x10   : > { %s561_s20 = sshll.u32 (!%p217_p9), %s557_s17, 4  ;;  %s562_s20 = int_to_ptr.hbm [resolvable:$true] %s561_s20 }
  0x11   : > { %s734_s28 = sshra.s32 (!%p217_p9), %s562_s20, 4  ;;  %s735_s28 = int_to_ptr.hbm [resolvable:$true] %s734_s28 }
  0x12   : > { %s736_s25 = scalar_lea.hbm (!%p217_p9), %s735_s28, 16  ;;  %p741_p0 = scmp.lt.s32.totalorder (!%p217_p9), %s735_s28, %s969_s6 }
  0x13   : > { %v453_v0 = vld [vmem:[%s966_s3 + $0x8] sm:$0xff]  ;;  %v784_v1 = vmov 0   ;;  %s977_s9 = smov (!%p247_p10, %s626_s9), 3  ;;  %vm387_vm0 = vcmask 1046528   ;;  %v255_v2 = vld [vmem:[%s964_s1] sm:$0xff]  ;;  %vm374_vm1 = vcmask 56320   ;;  %v273_v15 = vlaneseq  ;;  %p737_p11 = scmp.ne.s32.totalorder %s735_s28, %s736_s25 }
  0x14   : > { %718 = vset.pattern.permute.xlu1 %v784_v1  ;;  %717 = vset.pattern.permute.xlu0 %v784_v1  ;;  %s627_s12 = sshll.u32 %s977_s9, 3  ;;  %v452_v7 = vld [vmem:[%s966_s3] sm:$0xff]  ;;  %v455_v14 = vld [vmem:[%s966_s3 + $0x18] sm:$0xff]  ;;  %v256_v17 = vld [vmem:[%s964_s1 + $0x8] sm:$0xff]  ;;  %v785_v31 = vmov 1.0   ;;  %p742_p1 = scmp.lt.s32.totalorder %s740_s10, %s736_s25 }
  0x15   : > { %463 = vperm.xlu1 %718, %v453_v0   ;;  %719 = vset.pattern.permute.xlu2 %v784_v1  ;;  %s250_s15 = scalar_lea.vmem %s963_s0, %s627_s12  ;;  %v274_v20 = vshrl.u32 %v273_v15, 7  ;;  %v454_v30 = vld [vmem:[%s966_s3 + $0x10] sm:$0xff]  ;;  %v299_v33 = vld [vmem:[%s965_s2] sm:$0xff]  ;;  %v258_v34 = vld [vmem:[%s964_s1 + $0x18] sm:$0xff]  ;;  %s243_s12 = sand.u32 1, %s774_s22  }
  0x16   : > { %v253_v3 = vld [vmem:[%s250_s15] sm:$0x7f]  ;;  %v254_v4 = vld [vmem:[%s250_s15 + $0x8] sm:$0x7f]  ;;  %473 = vperm.xlu0 %717, %v455_v14   ;;  %v257_v32 = vld [vmem:[%s964_s1 + $0x10] sm:$0xff]  ;;  %s625_s13 = sshll.u32 %s243_s12, 4  ;;  %p738_p12 = pnand %p737_p11, %p859_p5 }
  0x17   : > { %vm666_vm2 = vcmp.lt.s32.totalorder %v253_v3, 0  ;;  %v667_v5 = vceil.f32 %v253_v3  ;;  %v668_v6 = vfloor.f32 %v253_v3  ;;  %648 = vmatpush.msk.msra.mxu2 %vm387_vm0, %v253_v3  ;;  %vm671_vm3 = vcmp.lt.s32.totalorder %v254_v4, 0  ;;  %653 = vmatpush.msk.msra.mxu3 %vm387_vm0, %v254_v4  ;;  %v300_v35 = vld [vmem:[%s965_s2 + $0x8] sm:$0xff]  ;;  %v301_v36 = vld [vmem:[%s965_s2 + $0x10] sm:$0xff]  ;;  %v302_v37 = vld [vmem:[%s965_s2 + $0x18] sm:$0xff]  ;;  %s245_s18 = scalar_lea.vmem [#allocation2], %s625_s13  ;;  %p743_p2 = por %p742_p1, %p741_p0 }
  0x18   : > { %v672_v8 = vceil.f32 %v254_v4  ;;  %v673_v9 = vfloor.f32 %v254_v4  ;;  %649 = vmatmul.msk.f32.vlgmr.msra.gmra.mxu2 %vm374_vm1, %v255_v2  ;;  %654 = vmatmul.msk.f32.vlgmr.msra.gmra.mxu3 %vm374_vm1, %v255_v2  ;;  %vm303_vm0 = vcmask 195584   ;;  %v493_v44 = vld [vmem:[%s968_s5] sm:$0xff]  ;;  %s559_s19 = sshll.u32 %s245_s18, 4  ;;  %s546_s26 = scalar_lea.sflag [#allocation3], %s243_s12  ;;  %s560_s19 = int_to_ptr.vmem [resolvable:$true] %s559_s19 }
  0x19   : > { %v669_v10 = vsel %vm666_vm2, %v667_v5, %v668_v6  ;;  %496 = vperm.xlu2 %719, %v493_v44   ;;  %p739_p13 = pneg %p738_p12 }
  0x1a   : > { %v670_v11 = vcvt.f32.s32 %v669_v10  ;;  %v674_v12 = vsel %vm671_vm3, %v672_v8, %v673_v9 }
  0x1b   : > { %v675_v13 = vcvt.f32.s32 %v674_v12  ;;  %p744_p3 = pnand %p743_p2, %p739_p13 }
  0x1c   : > { %vm261_vm4 = vcmp.eq.s32.totalorder %v670_v11, 4294967295 }
  0x1d   : > { %458 = vperm.xlu1 %718, %v452_v7   ;;  %v263_v16 = vsel %vm261_vm4, 7, %v670_v11  ;;  %vm262_vm5 = vcmp.eq.s32.totalorder %v675_v13, 4294967295 }
  0x1e   : > { %vm265_vm6 = vcmp.gt.s32.totalorder %v263_v16, 0  ;;  %v264_v18 = vsel %vm262_vm5, 7, %v675_v13  ;;  %468 = vperm.xlu0 %717, %v454_v30  }
  0x1f   : > { %v266_v19 = vsel %vm265_vm6, %v263_v16, 0  ;;  %vm267_vm7 = vcmp.gt.s32.totalorder %v264_v18, 0 }
  0x20   : > { %vm269_vm8 = vcmp.lt.s32.totalorder %v266_v19, 7  ;;  %v268_v21 = vsel %vm267_vm7, %v264_v18, 0  ;;  %650 = vmatmul.msk.f32.gmra.mxu2 %vm374_vm1, %v256_v17  ;;  %655 = vmatmul.msk.f32.gmra.mxu3 %vm374_vm1, %v256_v17  ;;  %v492_v18 = vld [vmem:[%s967_s4] sm:$0xff] }
  0x21   : > { %v270_v22 = vsel %vm269_vm8, %v266_v19, 7  ;;  %vm271_vm9 = vcmp.lt.s32.totalorder %v268_v21, 7 }
  0x22   : > { %v291_v23 = vperm.slane %v270_v22, 6  ;;  %v272_v24 = vsel %vm271_vm9, %v268_v21, 7  ;;  %v283_v25 = vperm.slane %v270_v22, 5  ;;  %v275_v26 = vperm.slane %v270_v22, 4 }
  0x23   : > { %v292_v27 = vperm.slane %v272_v24, 6  ;;  %v284_v28 = vperm.slane %v272_v24, 5  ;;  %v276_v29 = vperm.slane %v272_v24, 4 }
  0x24   : > { %vm293_vm10 = vcmp.eq.s32.totalorder %v291_v23, %v274_v20  ;;  %vm285_vm11 = vcmp.eq.s32.totalorder %v283_v25, %v274_v20  ;;  %vm277_vm14 = vcmp.eq.s32.totalorder %v275_v26, %v274_v20 }
  0x25   : > { %634 = vmatpush.msk.msra.mxu0 %vm293_vm10, %v785_v31  ;;  %vm294_vm12 = vcmp.eq.s32.totalorder %v292_v27, %v274_v20  ;;  %vm286_vm13 = vcmp.eq.s32.totalorder %v284_v28, %v274_v20  ;;  %vm278_vm15 = vcmp.eq.s32.totalorder %v276_v29, %v274_v20 }
  0x26   : > { %641 = vmatpush.msk.msra.mxu1 %vm294_vm12, %v785_v31 }
  0x27   : > { %635 = vmatpush.msk.msra.mxu0 %vm285_vm11, %v785_v31 }
  0x28   : > { %642 = vmatpush.msk.msra.mxu1 %vm286_vm13, %v785_v31  ;;  %651 = vmatmul.msk.f32.gmra.mxu2 %vm374_vm1, %v257_v32 }
  0x29   : > { %636 = vmatpush.msk.msra.mxu0 %vm277_vm14, %v785_v31  ;;  %656 = vmatmul.msk.f32.gmra.mxu3 %vm374_vm1, %v257_v32 }
  0x2a   : > { %643 = vmatpush.msk.msra.mxu1 %vm278_vm15, %v785_v31  ;;  %637 = vmatmul.msk.f32.vlgmr.msra.gmra.mxu0 %vm303_vm0, %v299_v33 }
  0x2b   : > { %644 = vmatmul.msk.f32.vlgmr.msra.gmra.mxu1 %vm303_vm0, %v299_v33 }
  0x30   : > { %652 = vmatmul.msk.f32.gmra.mxu2 %vm374_vm1, %v258_v34 }
  0x31   : > { %657 = vmatmul.msk.f32.gmra.mxu3 %vm374_vm1, %v258_v34  ;;  %vm499_vm1 = vcmask 261120  }
  0x32   : > { %638 = vmatmul.msk.f32.gmra.mxu0 %vm303_vm0, %v300_v35 }
  0x33   : > { %645 = vmatmul.msk.f32.gmra.mxu1 %vm303_vm0, %v300_v35 }
  0x3a   : > { %639 = vmatmul.msk.f32.gmra.mxu0 %vm303_vm0, %v301_v36 }
  0x3b   : > { %646 = vmatmul.msk.f32.gmra.mxu1 %vm303_vm0, %v301_v36 }
  0x42   : > { %640 = vmatmul.msk.f32.gmra.mxu0 %vm303_vm0, %v302_v37 }
  0x43   : > { %647 = vmatmul.msk.f32.gmra.mxu1 %vm303_vm0, %v302_v37 }
  0x73   : > { %v497_v20 = vpop.permute.xlu2 %496 }
  0x87   : > { %v464_v52 = vpop.permute.xlu1 %463 }
  0x88   : > { %v474_v49 = vpop.permute.xlu0 %473 }
  0x8f   : > { %v459_v4 = vpop.permute.xlu1 %458 }
  0x90   : > { %v469_v57 = vpop.permute.xlu0 %468 }
  0x9b   : > { %v411_v38 = vpop.f32.mrf.mxu2  ;;  %v440_v39 = vpop.f32.mrf.mxu3 }
  0xa3   : > { %v414_v42 = vpop.f32.mrf.mxu2  ;;  %v443_v43 = vpop.f32.mrf.mxu3 }
  0xa7   : > { %v333_v40 = vpop.f32.mrf.mxu0 }
  0xa8   : > { %v362_v41 = vpop.f32.mrf.mxu1  ;;  %v412_v0 = vadd.f32 %v411_v38, %v333_v40 }
  0xa9   : > { %v441_v3 = vadd.f32 %v440_v39, %v362_v41 }
  0xaa   : > { %v476_v11 = vadd.f32 %v459_v4, %v412_v0 }
  0xab   : > { %v417_v47 = vpop.f32.mrf.mxu2  ;;  %v477_v13 = vadd.f32 %v459_v4, %v441_v3 }
  0xac   : > { %v446_v48 = vpop.f32.mrf.mxu3  ;;  %v484_v17 = vmax.f32 %v476_v11, 0.0 }
  0xad   : > { %v485_v19 = vmax.f32 %v477_v13, 0.0 }
  0xaf   : > { %v336_v45 = vpop.f32.mrf.mxu0 }
  0xb0   : > { %v365_v46 = vpop.f32.mrf.mxu1  ;;  %v415_v59 = vadd.f32 %v414_v42, %v336_v45 }
  0xb1   : > { %v444_v62 = vadd.f32 %v443_v43, %v365_v46 }
  0xb2   : > { %v478_v8 = vadd.f32 %v464_v52, %v415_v59 }
  0xb3   : > { %v420_v53 = vpop.f32.mrf.mxu2  ;;  %v479_v10 = vadd.f32 %v464_v52, %v444_v62 }
  0xb4   : > { %v449_v55 = vpop.f32.mrf.mxu3  ;;  %v486_v15 = vmax.f32 %v478_v8, 0.0 }
  0xb5   : > { %v487_v16 = vmax.f32 %v479_v10, 0.0 }
  0xb7   : > { %v339_v50 = vpop.f32.mrf.mxu0 }
  0xb8   : > { %v368_v51 = vpop.f32.mrf.mxu1  ;;  %v418_v54 = vadd.f32 %v417_v47, %v339_v50 }
  0xb9   : > { %v447_v56 = vadd.f32 %v446_v48, %v368_v51 }
  0xba   : > { %v480_v1 = vadd.f32 %v469_v57, %v418_v54 }
  0xbb   : > { %v481_v5 = vadd.f32 %v469_v57, %v447_v56 }
  0xbc   : > { %v488_v12 = vmax.f32 %v480_v1, 0.0 }
  0xbd   : > { %v489_v14 = vmax.f32 %v481_v5, 0.0 }
  0xbf   : > { %v342_v58 = vpop.f32.mrf.mxu0 }
  0xc0   : > { %v371_v60 = vpop.f32.mrf.mxu1  ;;  %v421_v61 = vadd.f32 %v420_v53, %v342_v58 }
  0xc1   : > { %v450_v63 = vadd.f32 %v449_v55, %v371_v60 }
  0xc2   : > { %v482_v2 = vadd.f32 %v474_v49, %v421_v61 }
  0xc3   : > { %v483_v6 = vadd.f32 %v474_v49, %v450_v63 }
  0xc4   : > { %v490_v7 = vmax.f32 %v482_v2, 0.0 }
  0xc5   : > { %v491_v9 = vmax.f32 %v483_v6, 0.0 }
  0xc6   : > { %515 = vmatpush.msrb.mxu2 %v490_v7 }
  0xc7   : > { %535 = vmatpush.msrb.mxu3 %v491_v9 }
  0xc8   : > { %516 = vmatpush.msrb.mxu2 %v488_v12 }
  0xc9   : > { %536 = vmatpush.msrb.mxu3 %v489_v14 }
  0xca   : > { %517 = vmatpush.msrb.mxu2 %v486_v15 }
  0xcb   : > { %537 = vmatpush.msrb.mxu3 %v487_v16 }
  0xcc   : > { %518 = vmatpush.msrb.mxu2 %v484_v17 }
  0xcd   : > { %538 = vmatpush.msrb.mxu3 %v485_v19  ;;  %658 = vmatmul.msk.f32.vlgmr.msrb.gmra.mxu2 %vm499_vm1, %v492_v18 }
  0xce   : > { %659 = vmatmul.msk.f32.vlgmr.msrb.gmra.mxu3 %vm499_vm1, %v492_v18 }
 0x150   : > { %v520_v21 = vpop.f32.mrf.mxu2 }
 0x151   : > { %v521_v22 = vadd.f32 %v520_v21, %v497_v20  ;;  %v540_v23 = vpop.f32.mrf.mxu3 }
 0x152   : > { %v541_v24 = vadd.f32 %v540_v23, %v497_v20 }
 0x153   : > { %543 = vst [vmem:[%s245_s18] sm:$0xff] %v521_v22 }
 0x154   : > { %544 = vst [vmem:[%s245_s18 + $0x8] sm:$0xff] %v541_v24 }
 0x155   : > { %747 = shalt.err (!%p744_p3)
}
 0x156   : > { %676 = dma.vmem_to_hbm [thread:$0]  (%p859_p5), %s560_s19, 256, %s562_s20, %s546_s26  }
 0x157 PF: > { %p682_p4 = scmp.ge.s32.totalorder %s782_s24, 2  ;;  %s573_s12 = sand.u32 1, %s770_s21  }
 0x158   : > { %s574_s14 = scalar_lea.sflag [#allocation3], %s573_s12 }
 0x159   : > { %p679_p7 = pnand %p682_p4, %p863_p6 }
 0x15b   : > { %p680_p8 = pneg %p679_p7 }
 0x15d   : > { %765 = dma.done.wait (%p680_p8), %s574_s14, 256  }
 0x15e   : > { %767 = vsyncadd (%p680_p8), %s574_s14, 4294967040  ;;  %p16_p9 = scmp.ge.s32.totalorder %s846_s27, 4   ;;  %s972_s21 = smov %s774_s22 }
 0x15f   : > { %s973_s22 = smov %s778_s23  ;;  %s974_s23 = smov %s857_s30 }
 0x160   : > { %s975_s24 = smov %s846_s27  ;;  %18 = sbr.rel (!%p16_p9) target bundleno = 3 (0x3), region = 79 }
 0x165   :  { %580 = vsyncpa [#allocation3], 1 }
 0x166   :  { %582 = vsyncpa [#allocation3 + $0x1], 1 }

</bundles_post_ra>
